<compile_context>
chip_gen: v5e
topology: v5e:2x2
jax: 0.10.0
libtpu: 0.0.40
codegen_flags: <defaults>
</compile_context>

<pallas_src>
import functools

import jax
import jax.numpy as jnp
from jax.experimental import pallas as pl
from jax.experimental.pallas import tpu as pltpu


def _decomp_kernel(x_ref, mean_ref, res_ref, *, kernel_size: int, use_cumsum: bool):
    """Per-lane-tile series decomposition.

    x_ref:    (L, TN) block in VMEM — time on sublanes, folded batch*channel on lanes.
    mean_ref: (L, TN) moving average (edge-replicated padding, stride 1).
    res_ref:  (L, TN) residual = x - moving_mean.
    """
    x = x_ref[...]                                   # (L, TN)
    seq_len = x.shape[0]
    pad = (kernel_size - 1) // 2

    if pad == 0:                                     # kernel_size == 1: mean == x
        mean_ref[...] = x
        res_ref[...] = jnp.zeros_like(x)
        return

    acc_dtype = jnp.float32
    xf = x.astype(acc_dtype)                         # no-op when x is already f32
    row = jax.lax.broadcasted_iota(jnp.int32, xf.shape, 0)
    # Hoisted edge-row broadcasts (JAX does not CSE broadcast_in_dim, so build
    # these once and reuse inside the loops below).
    first = jnp.broadcast_to(xf[0:1, :], xf.shape)
    last = jnp.broadcast_to(xf[seq_len - 1:seq_len, :], xf.shape)

    if use_cumsum:
        # Inclusive prefix sum along time (Hillis-Steele scan: log2(L) rolls).
        cs = xf
        shift = 1
        while shift < seq_len:
            shifted = pltpu.roll(cs, shift, axis=0)          # cs[(t - shift) mod L]
            cs = cs + jnp.where(row >= shift, shifted, 0.0)
            shift *= 2
        total = jnp.broadcast_to(cs[seq_len - 1:seq_len, :], cs.shape)
        # hi[t] = cs[min(t + pad, L - 1)]
        hi = pltpu.roll(cs, seq_len - pad, axis=0)           # cs[(t + pad) mod L]
        hi = jnp.where(row >= seq_len - pad, total, hi)
        # lo[t] = cs[t - pad - 1] if t >= pad + 1 else 0
        lo = pltpu.roll(cs, pad + 1, axis=0)                 # cs[(t - pad - 1) mod L]
        lo = jnp.where(row >= pad + 1, lo, 0.0)
        # Counts of edge-replicated samples falling outside [0, L-1].
        left_cnt = jnp.maximum(pad - row, 0).astype(acc_dtype)
        right_cnt = jnp.maximum(row + pad - (seq_len - 1), 0).astype(acc_dtype)
        window_sum = (hi - lo) + left_cnt * first + right_cnt * last
    else:
        # Small window: unrolled sum of rolled views + edge fixups.
        window_sum = xf                                       # center (s = 0) term
        for s in range(1, pad + 1):
            if s >= seq_len:
                fwd = last
                bwd = first
            else:
                fwd = pltpu.roll(xf, seq_len - s, axis=0)     # x[(t + s) mod L]
                fwd = jnp.where(row >= seq_len - s, last, fwd)
                bwd = pltpu.roll(xf, s, axis=0)               # x[(t - s) mod L]
                bwd = jnp.where(row < s, first, bwd)
            window_sum = window_sum + fwd + bwd

    mean = (window_sum * (1.0 / kernel_size)).astype(x.dtype)
    mean_ref[...] = mean
    res_ref[...] = x - mean


def series_decomp(x: jax.Array, kernel_size: int, *, lane_tile: int = 1024):
    """Pallas implementation of series_decomp.forward.

    Args:
      x: (B, L, C) array (batch, time, channel).
      kernel_size: moving-average window (odd, so output length == L).
    Returns:
      (moving_mean, residual), each (B, L, C).
    """
    B, L, C = x.shape
    assert kernel_size >= 1 and kernel_size % 2 == 1, "kernel_size must be odd"
    pad = (kernel_size - 1) // 2

    # Fold (batch, channel) into the lane axis: the moving average is along time
    # per (b, c), so (B, L, C) -> (L, B*C) is semantics-preserving and lane-dense.
    n = B * C
    x2 = jnp.transpose(x, (1, 0, 2)).reshape(L, n)

    itemsize = jnp.dtype(x.dtype).itemsize
    # Lane tile: multiple of 128, capped so one (L, tn) block stays ~<= 2 MiB
    # (3 blocks x 2 pipeline buffers + f32 temps fits comfortably in 32 MiB VMEM).
    tn_budget = max(128, ((2 * 1024 * 1024) // max(L * itemsize, 1)) // 128 * 128)
    tn = min(lane_tile, tn_budget, pl.cdiv(n, 128) * 128)
    tn = max(128, (tn // 128) * 128)
    n_pad = pl.cdiv(n, tn) * tn
    if n_pad != n:
        x2 = jnp.pad(x2, ((0, 0), (0, n_pad - n)))

    # TODO(synk): for very long sequences (L * 128 * itemsize >> 2 MiB) also tile L
    # with a manual halo DMA (memory_space=pl.ANY + pltpu.make_async_copy), since
    # BlockSpec cannot express the overlapping +/- pad halo along time.

    use_cumsum = (kernel_size > 7) and (pad + 1) < L
    kernel = functools.partial(
        _decomp_kernel, kernel_size=kernel_size, use_cumsum=use_cumsum)

    spec = pl.BlockSpec((L, tn), lambda g: (0, g))
    total_bytes = 3 * L * n_pad * itemsize            # 1 read + 2 writes (HBM-bound)
    mean2, res2 = pl.pallas_call(
        kernel,
        out_shape=(jax.ShapeDtypeStruct((L, n_pad), x.dtype),
                   jax.ShapeDtypeStruct((L, n_pad), x.dtype)),
        grid_spec=pltpu.PrefetchScalarGridSpec(
            num_scalar_prefetch=0,
            grid=(n_pad // tn,),
            in_specs=[spec],
            out_specs=[spec, spec],
        ),
        compiler_params=pltpu.CompilerParams(
            dimension_semantics=("parallel",),
            vmem_limit_bytes=32 * 1024 * 1024,
        ),
        cost_estimate=pl.CostEstimate(
            flops=4 * L * n_pad, transcendentals=0, bytes_accessed=total_bytes),
    )(x2)

    mean = jnp.transpose(mean2[:, :n].reshape(L, B, C), (1, 0, 2))
    res = jnp.transpose(res2[:, :n].reshape(L, B, C), (1, 0, 2))
    return mean, res


def _reference(x, kernel_size):
    # Pure-JAX reference mirroring the PyTorch semantics.
    pad = (kernel_size - 1) // 2
    if pad == 0:
        return x, x - x
    front = jnp.repeat(x[:, 0:1, :], pad, axis=1)
    end = jnp.repeat(x[:, -1:, :], pad, axis=1)
    padded = jnp.concatenate([front, x, end], axis=1)          # (B, L+2p, C)
    windows = jnp.stack(
        [padded[:, j:j + x.shape[1], :] for j in range(kernel_size)], axis=0)
    mean = jnp.mean(windows.astype(jnp.float32), axis=0).astype(x.dtype)
    return mean, x - mean


def _check(x, kernel_size, atol, rtol):
    mean, res = series_decomp(x, kernel_size)
    jax.block_until_ready((mean, res))
    ref_mean, ref_res = _reference(x, kernel_size)
    assert jnp.allclose(mean, ref_mean, atol=atol, rtol=rtol)
    assert jnp.allclose(res, ref_res, atol=atol, rtol=rtol)
    assert jnp.allclose(mean + res, x, atol=atol, rtol=rtol)


if __name__ == "__main__":
    k0, k1, k2 = jax.random.split(jax.random.PRNGKey(0), 3)

    # Small-window (unrolled-roll) path, narrow channels (exercises lane padding).
    x = jax.random.normal(k0, (2, 16, 8), dtype=jnp.float32)
    _check(x, kernel_size=5, atol=1e-5, rtol=1e-5)

    # Large-window (cumsum-difference) path, non-power-of-two channel count.
    x = jax.random.normal(k1, (2, 32, 7), dtype=jnp.float32)
    _check(x, kernel_size=25, atol=1e-4, rtol=1e-4)

    # kernel_size == 1 guard (mean == x, residual == 0).
    x = jax.random.normal(k2, (2, 16, 8), dtype=jnp.float32)
    _check(x, kernel_size=1, atol=1e-6, rtol=1e-6)

    print("KERNEL_OK")
</pallas_src>

<mosaic_0001>
module attributes {stable_mosaic.version = 11 : i64} {
  func.func @_decomp_kernel(%arg0: i32, %arg1: memref<16x128xf32, #tpu.memory_space<vmem>>, %arg2: memref<16x128xf32, #tpu.memory_space<vmem>>, %arg3: memref<16x128xf32, #tpu.memory_space<vmem>>) attributes {dimension_semantics = [#tpu.dimension_semantics<parallel>], iteration_bounds = array<i64: 1>, scalar_prefetch = 0 : i64, scratch_operands = 0 : i64, tpu.core_type = #tpu.core_type<tc>, window_params = [{transform_indices = @transform_0, window_bounds = array<i64: 16, 128>}, {transform_indices = @transform_1, window_bounds = array<i64: 16, 128>}, {transform_indices = @transform_2, window_bounds = array<i64: 16, 128>}]} {
    %c0 = arith.constant 0 : index
    %c0_0 = arith.constant 0 : index
    %0 = vector.load %arg1[%c0, %c0_0] : memref<16x128xf32, #tpu.memory_space<vmem>>, vector<16x128xf32>
    %1 = tpu.iota {dimensions = array<i32: 0>} : vector<16x128xi32>
    %2 = vector.extract_strided_slice %0 {offsets = [0, 0], sizes = [1, 128], strides = [1, 1]} : vector<16x128xf32> to vector<1x128xf32>
    %3 = vector.shape_cast %2 : vector<1x128xf32> to vector<1x128xf32>
    %4 = vector.broadcast %3 : vector<1x128xf32> to vector<16x128xf32>
    %5 = vector.extract_strided_slice %0 {offsets = [15, 0], sizes = [1, 128], strides = [1, 1]} : vector<16x128xf32> to vector<1x128xf32>
    %6 = vector.shape_cast %5 : vector<1x128xf32> to vector<1x128xf32>
    %7 = vector.broadcast %6 : vector<1x128xf32> to vector<16x128xf32>
    %c15_i32 = arith.constant 15 : i32
    %8 = tpu.dynamic_rotate %0 by %c15_i32 dim 0 : vector<16x128xf32>, i32 -> vector<16x128xf32>
    %c15_i32_1 = arith.constant 15 : i32
    %9 = vector.broadcast %c15_i32_1 : i32 to vector<16x128xi32>
    %10 = arith.cmpi sge, %1, %9 : vector<16x128xi32>
    %11 = arith.select %10, %7, %8 : vector<16x128xi1>, vector<16x128xf32>
    %c1_i32 = arith.constant 1 : i32
    %12 = tpu.dynamic_rotate %0 by %c1_i32 dim 0 : vector<16x128xf32>, i32 -> vector<16x128xf32>
    %c1_i32_2 = arith.constant 1 : i32
    %13 = vector.broadcast %c1_i32_2 : i32 to vector<16x128xi32>
    %14 = arith.cmpi slt, %1, %13 : vector<16x128xi32>
    %15 = arith.select %14, %4, %12 : vector<16x128xi1>, vector<16x128xf32>
    %16 = arith.addf %0, %11 : vector<16x128xf32>
    %17 = arith.addf %16, %15 : vector<16x128xf32>
    %c14_i32 = arith.constant 14 : i32
    %18 = tpu.dynamic_rotate %0 by %c14_i32 dim 0 : vector<16x128xf32>, i32 -> vector<16x128xf32>
    %c14_i32_3 = arith.constant 14 : i32
    %19 = vector.broadcast %c14_i32_3 : i32 to vector<16x128xi32>
    %20 = arith.cmpi sge, %1, %19 : vector<16x128xi32>
    %21 = arith.select %20, %7, %18 : vector<16x128xi1>, vector<16x128xf32>
    %c2_i32 = arith.constant 2 : i32
    %22 = tpu.dynamic_rotate %0 by %c2_i32 dim 0 : vector<16x128xf32>, i32 -> vector<16x128xf32>
    %c2_i32_4 = arith.constant 2 : i32
    %23 = vector.broadcast %c2_i32_4 : i32 to vector<16x128xi32>
    %24 = arith.cmpi slt, %1, %23 : vector<16x128xi32>
    %25 = arith.select %24, %4, %22 : vector<16x128xi1>, vector<16x128xf32>
    %26 = arith.addf %17, %21 : vector<16x128xf32>
    %27 = arith.addf %26, %25 : vector<16x128xf32>
    %cst = arith.constant 2.000000e-01 : f32
    %28 = vector.broadcast %cst : f32 to vector<16x128xf32>
    %29 = arith.mulf %27, %28 : vector<16x128xf32>
    %c0_5 = arith.constant 0 : index
    %c0_6 = arith.constant 0 : index
    %30 = vector.load %arg2[%c0_5, %c0_6] : memref<16x128xf32, #tpu.memory_space<vmem>>, vector<16x128xf32>
    tpu.vector_store %arg2[%c0_5, %c0_6], %29 {strides = array<i32>} : memref<16x128xf32, #tpu.memory_space<vmem>>, vector<16x128xf32>,
    %31 = arith.subf %0, %29 : vector<16x128xf32>
    %c0_7 = arith.constant 0 : index
    %c0_8 = arith.constant 0 : index
    %32 = vector.load %arg3[%c0_7, %c0_8] : memref<16x128xf32, #tpu.memory_space<vmem>>, vector<16x128xf32>
    tpu.vector_store %arg3[%c0_7, %c0_8], %31 {strides = array<i32>} : memref<16x128xf32, #tpu.memory_space<vmem>>, vector<16x128xf32>,
    return
  }
  func.func @transform_0(%arg0: i32) -> (i32, i32) {
    %c0_i32 = arith.constant 0 : i32
    %c0_i32_0 = arith.constant 0 : i32
    return %c0_i32, %arg0 : i32, i32
  }
  func.func @transform_1(%arg0: i32) -> (i32, i32) {
    %c0_i32 = arith.constant 0 : i32
    %c0_i32_0 = arith.constant 0 : i32
    return %c0_i32, %arg0 : i32, i32
  }
  func.func @transform_2(%arg0: i32) -> (i32, i32) {
    %c0_i32 = arith.constant 0 : i32
    %c0_i32_0 = arith.constant 0 : i32
    return %c0_i32, %arg0 : i32, i32
  }
}

</mosaic_0001>

<bundles_post_ra>
// kernel: tpu_custom_call.1
= control target key start
LH: loop header
LB: loop body
LE: loop exit
PB: predicated region body
PF: predicated region fallthrough
CT: control target
= control target key end

     0   :  { %8 = vsyncpa [#allocation3], 0  ;;  %s255_s0 = inlined_call_operand.hbm [shape: f32[16,128], index: 0, kind: input, shape index: {}]   ;;  %s256_s1 = inlined_call_operand.hbm [shape: f32[16,128], index: 1, kind: output, shape index: {0}]   ;;  %s257_s2 = inlined_call_operand.hbm [shape: f32[16,128], index: 2, kind: output, shape index: {1}]  }
   0x1   :  { %9 = vsyncpa [#allocation4], 0 }
   0x2   :  { %10 = vsyncpa [#allocation7], 0  ;;  %s15_s11 = sshll.u32 %s255_s0, 4  ;;  %s205_s12 = smov [#allocation2]   ;;  %s16_s11 = int_to_ptr.hbm [resolvable:$true] %s15_s11 }
   0x3   :  { %s17_s13 = sshll.u32 %s205_s12, 4  ;;  %s206_s14 = smov 128   ;;  %s18_s13 = int_to_ptr.vmem [resolvable:$true] %s17_s13 }
   0x4   :  { %s207_s15 = smov 8  }
   0x5   :  { %23 = dma.hbm_to_vmem [thread:$0]  %s16_s11, 256, %s18_s13, [#allocation3], %s206_s14, %s206_s14, %s207_s15  }
   0x6   :  { %199 = dma.done.wait [#allocation3], 256  }
   0x7   :  { %200 = vsyncadd [#allocation3], 4294967040  ;;  %v30_v0 = vlaneseq  ;;  %v28_v3 = vld [vmem:[#allocation2] sm:$0xff]  ;;  %v29_v4 = vld [vmem:[#allocation2 + $0x8] sm:$0xff]  ;;  %s208_s0 = smov [#allocation5]   ;;  %s91_s19 = sshll.u32 %s256_s1, 4  ;;  %s92_s19 = int_to_ptr.hbm [resolvable:$true] %s91_s19 }
   0x8   :  { %v33_v5 = vperm.slane %v28_v3, 0  ;;  %v35_v6 = vrot.slane %v28_v3, 1  ;;  %v36_v7 = vrot.slane %v29_v4, 1  ;;  %v44_v8 = vrot.slane %v28_v3, 7  ;;  %s89_s16 = sshll.u32 %s208_s0, 4  ;;  %s209_s20 = smov [#allocation6]   ;;  %s90_s16 = int_to_ptr.vmem [resolvable:$true] %s89_s16 }
   0x9   :  { %v31_v1 = vshrl.u32 %v30_v0, 7  ;;  %v45_v9 = vrot.slane %v29_v4, 7  ;;  %v56_v10 = vrot.slane %v28_v3, 2  ;;  %v57_v11 = vrot.slane %v29_v4, 2  ;;  %s102_s21 = sshll.u32 %s209_s20, 4  ;;  %s104_s24 = sshll.u32 %s257_s2, 4  ;;  %s103_s21 = int_to_ptr.vmem [resolvable:$true] %s102_s21  ;;  %s105_s24 = int_to_ptr.hbm [resolvable:$true] %s104_s24 }
   0xa   :  { %v65_v12 = vrot.slane %v28_v3, 6  ;;  %v66_v14 = vrot.slane %v29_v4, 6  ;;  %v34_v15 = vperm.slane %v29_v4, 7 }
   0xb   :  { %v32_v2 = vadd.s32 8, %v31_v1  ;;  %vm37_vm0 = vcmp.lt.s32.totalorder %v31_v1, 7  ;;  %vm46_vm1 = vcmp.lt.s32.totalorder %v31_v1, 1  ;;  %vm58_vm2 = vcmp.lt.s32.totalorder %v31_v1, 6 }
   0xc   :  { %vm67_vm3 = vcmp.lt.s32.totalorder %v31_v1, 2  ;;  %v38_v13 = vsel %vm37_vm0, %v35_v6, %v36_v7  ;;  %v39_v16 = vsel %vm37_vm0, %v36_v7, %v35_v6  ;;  %v48_v17 = vsel %vm46_vm1, %v45_v9, %v44_v8 }
   0xd   :  { %vm41_vm4 = vcmp.ge.s32.totalorder %v32_v2, 15  ;;  %vm62_vm5 = vcmp.ge.s32.totalorder %v32_v2, 14  ;;  %v52_v18 = vadd.f32 %v38_v13, %v28_v3  ;;  %v59_v19 = vsel %vm58_vm2, %v56_v10, %v57_v11 }
   0xe   :  { %v47_v20 = vsel %vm46_vm1, %v44_v8, %v45_v9  ;;  %v50_v21 = vsel %vm46_vm1, %v33_v5, %v48_v17  ;;  %v69_v22 = vsel %vm67_vm3, %v66_v14, %v65_v12  ;;  %v43_v23 = vsel %vm41_vm4, %v34_v15, %v39_v16 }
   0xf   :  { %v60_v24 = vsel %vm58_vm2, %v57_v11, %v56_v10  ;;  %v54_v25 = vadd.f32 %v52_v18, %v50_v21  ;;  %v53_v26 = vadd.f32 %v43_v23, %v29_v4  ;;  %v71_v27 = vsel %vm67_vm3, %v33_v5, %v69_v22 }
  0x10   :  { %v64_v28 = vsel %vm62_vm5, %v34_v15, %v60_v24  ;;  %v68_v31 = vsel %vm67_vm3, %v65_v12, %v66_v14 }
  0x11   :  { %v73_v29 = vadd.f32 %v59_v19, %v54_v25  ;;  %v55_v30 = vadd.f32 %v53_v26, %v47_v20 }
  0x13   :  { %v75_v32 = vadd.f32 %v73_v29, %v71_v27  ;;  %v74_v33 = vadd.f32 %v64_v28, %v55_v30 }
  0x15   :  { %v77_v34 = vmul.f32 0.2, %v75_v32  ;;  %v76_v35 = vadd.f32 %v74_v33, %v68_v31 }
  0x17   :  { %79 = vst [vmem:[#allocation5] sm:$0xff] %v77_v34  ;;  %v78_v36 = vmul.f32 0.2, %v76_v35  ;;  %v81_v37 = vsub.f32 %v28_v3, %v77_v34 }
  0x19   :  { %80 = vst [vmem:[#allocation5 + $0x8] sm:$0xff] %v78_v36  ;;  %v82_v38 = vsub.f32 %v29_v4, %v78_v36 }
  0x1a   :  { %83 = vst [vmem:[#allocation6] sm:$0xff] %v81_v37  ;;  %97 = dma.vmem_to_hbm [thread:$0]  %s90_s16, 256, %s92_s19, [#allocation4], %s206_s14, %s206_s14, %s207_s15  }
  0x1b   :  { %84 = vst [vmem:[#allocation6 + $0x8] sm:$0xff] %v82_v38 }
  0x1c   :  { %110 = dma.vmem_to_hbm [thread:$0]  %s103_s21, 256, %s105_s24, [#allocation7], %s206_s14, %s206_s14, %s207_s15  }
  0x1d   :  { %201 = dma.done.wait [#allocation4], 256  }
  0x1e   :  { %202 = vsyncadd [#allocation4], 4294967040 }
  0x1f   :  { %203 = dma.done.wait [#allocation7], 256  }
  0x20   :  { %204 = vsyncadd [#allocation7], 4294967040 }
  0x21   :  { %119 = vsyncpa [#allocation3], 1 }
  0x22   :  { %120 = vsyncpa [#allocation4], 1 }
  0x23   :  { %121 = vsyncpa [#allocation7], 1 }

</bundles_post_ra>
